<compile_context>
chip_gen: v5e
topology: v5e:2x2
jax: 0.10.0
libtpu: 0.0.40
codegen_flags: <defaults>
</compile_context>

<pallas_src>
import jax
import jax.numpy as jnp
from jax.experimental import pallas as pl
from jax.experimental.pallas import tpu as pltpu


# ----------------------------------------------------------------------------
# Kernel
# ----------------------------------------------------------------------------
def _attn_lse_pool_kernel(x_ref, mask_ref, wa_ref, ba_ref, w_ref, bw_ref,
                          utter_ref, attw_ref, blse_ref,
                          m_sc, l_sc, acc_sc):
    """One grid step = (one batch tile, one T tile).

    x_ref    : VMEM bf16 [TB, TT, H]   frames of this (batch tile, T tile)
    mask_ref : VMEM f32  [TB, TT]      additive attention mask
    wa_ref   : VMEM bf16 [H, H],  ba_ref f32 [1, H]     (W_a)
    w_ref    : VMEM bf16 [H, N],  bw_ref f32 [1, N]     (W, N = nheads)
    utter_ref: VMEM f32  [TB, H]       resident across the T axis
    attw_ref : VMEM f32  [TB, T_pad]   resident across the T axis
    blse_ref : VMEM f32  [TB, TT, N]
    m_sc,l_sc: VMEM f32  [TB, 1]       online-softmax running max / denominator
    acc_sc   : VMEM f32  [TB, H]       online-softmax weighted-sum accumulator
    """
    ti = pl.program_id(1)
    nt = pl.num_programs(1)
    TB, TT, H = x_ref.shape
    N = blse_ref.shape[2]
    T_pad = attw_ref.shape[1]

    @pl.when(ti == 0)
    def _():
        m_sc[...] = jnp.full_like(m_sc, -jnp.inf)
        l_sc[...] = jnp.zeros_like(l_sc)
        acc_sc[...] = jnp.zeros_like(acc_sc)

    x = x_ref[...]                                            # [TB, TT, H] bf16

    # --- attention-score MLP on the MXU (bf16 operands, f32 accumulation) ---
    x2 = x.reshape(TB * TT, H)
    h1 = jnp.dot(x2, wa_ref[...], preferred_element_type=jnp.float32) + ba_ref[...]
    h1 = jnp.maximum(h1, 0.0)                                 # ReLU (f32)
    logits2 = jnp.dot(h1.astype(w_ref.dtype), w_ref[...],
                      preferred_element_type=jnp.float32) + bw_ref[...]
    logits = logits2.reshape(TB, TT, N)                       # [TB, TT, N] f32
    blse_ref[...] = logits.astype(blse_ref.dtype)

    # --- logsumexp over heads + additive mask -> per-frame score ---
    hmax = jnp.max(logits, axis=-1)                           # [TB, TT]
    lse = hmax + jnp.log(jnp.sum(jnp.exp(logits - hmax[..., None]), axis=-1))
    s = lse + mask_ref[...]                                   # [TB, TT] f32

    # Stash raw masked scores in the T-resident att_w output buffer; they are
    # normalized into softmax weights on the last T step.
    if TT == T_pad:
        attw_ref[...] = s
    else:
        start = pl.multiple_of(ti * TT, 128)                  # TT is a multiple of 128 here
        attw_ref[:, pl.ds(start, TT)] = s

    # --- online softmax over the T axis ---
    m_prev = m_sc[...]
    m_new = jnp.maximum(m_prev, jnp.max(s, axis=-1, keepdims=True))   # [TB, 1]
    alpha = jnp.exp(m_prev - m_new)
    p = jnp.exp(s - m_new)                                    # [TB, TT]
    l_sc[...] = alpha * l_sc[...] + jnp.sum(p, axis=-1, keepdims=True)
    acc_sc[...] = alpha * acc_sc[...] + jnp.sum(
        x.astype(jnp.float32) * p[..., None], axis=1)
    m_sc[...] = m_new

    @pl.when(ti == nt - 1)
    def _():
        inv_l = pl.reciprocal(l_sc[...], approx=False)        # exact; [TB, 1] is tiny
        utter_ref[...] = (acc_sc[...] * inv_l).astype(utter_ref.dtype)
        s_full = attw_ref[...]                                # [TB, T_pad] masked scores
        attw_ref[...] = (jnp.exp(s_full - m_sc[...]) * inv_l).astype(attw_ref.dtype)


# ----------------------------------------------------------------------------
# Hardware / tiling heuristics
# ----------------------------------------------------------------------------
def _device_kind():
    try:
        return jax.devices()[0].device_kind.lower()
    except Exception:
        return ""


def _vmem_capacity_bytes():
    try:
        info = pltpu.get_tpu_info()
        cap = getattr(info, "vmem_capacity_bytes", None)
        if cap:
            return int(cap)
    except Exception:
        pass
    kind = _device_kind()
    if "v7" in kind:
        return 64 << 20
    if kind:
        return 128 << 20          # v5e / v6e
    return 64 << 20               # unknown: be conservative


def _has_two_tensorcores():
    return "v7" in _device_kind()


def _derive_block_t(H, TB, vmem_cap):
    """Target ~25% of VMEM for the double-buffered bf16 x tile."""
    budget = max(2 << 20, vmem_cap // 4)
    frames = budget // max(1, 2 * TB * H * 2)        # 2 bufs * bf16
    return int(max(128, min(2048, (frames // 128) * 128)))


def _estimate_vmem_bytes(TB, TT, T_pad, H, N):
    db = 2                                            # double buffering
    x_b = db * TB * TT * H * 2                        # bf16 frames
    mask_b = db * TB * TT * 4
    w_b = db * (H * H * 2 + H * N * 2 + (H + N) * 4)  # bf16 weights + f32 biases
    out_b = db * (TB * H * 4 + TB * T_pad * 4 + TB * TT * N * 4)
    scr_b = (2 * TB + TB * H) * 4
    slack = 1 << 20
    return x_b + mask_b + w_b + out_b + scr_b + slack


# ----------------------------------------------------------------------------
# Wrapper
# ----------------------------------------------------------------------------
def attentive_lse_pooling(batch_rep, att_mask, wa, ba, w, bw,
                          *, block_b=8, block_t=None):
    """Pallas forward of AttentiveLSEPoolingModule (nheads > 1).

    batch_rep [B,T,H] f32, att_mask [B,T] f32 additive mask (0 valid / -1e9 pad)
    wa [H,H], ba [1,H], w [H,nheads], bw [1,nheads]   (weights stored [in, out])
    Returns (utter_rep [B,H], att_w [B,T,1], att_logits_before_lse [B,T,nheads]).
    """
    B, T, H = batch_rep.shape
    N = w.shape[1]
    assert N > 1, "nheads == 1 degenerates in the torch module (squeeze + LSE over T)"

    vmem_cap = _vmem_capacity_bytes()

    # --- batch tile: multiple of 8 (or == B); on 2-TC chips keep >= 2 tiles ---
    TB = B if B <= block_b else block_b
    if _has_two_tensorcores() and B >= 16:
        TB = min(TB, max(8, ((B // 2) // 8) * 8))
    B_pad = TB * pl.cdiv(B, TB)

    # --- T tile: derive from VMEM budget; always pad + tile long sequences ---
    if block_t is None:
        block_t = _derive_block_t(H, TB, vmem_cap)
    block_t = max(128, (block_t // 128) * 128)
    if T <= block_t:
        TT, T_pad = T, T
    else:
        TT = block_t
        T_pad = TT * pl.cdiv(T, TT)
    nb = B_pad // TB
    nt = T_pad // TT

    # --- pad inputs (zero frames, -1e9 mask: numerically inert, no NaNs) ---
    x = batch_rep.astype(jnp.bfloat16)
    mask = att_mask.astype(jnp.float32)
    if (B_pad != B) or (T_pad != T):
        x = jnp.pad(x, ((0, B_pad - B), (0, T_pad - T), (0, 0)))
        mask = jnp.pad(mask, ((0, B_pad - B), (0, T_pad - T)),
                       constant_values=-1e9)

    wa_bf = wa.astype(jnp.bfloat16)
    w_bf = w.astype(jnp.bfloat16)
    ba_f = ba.astype(jnp.float32).reshape(1, H)
    bw_f = bw.astype(jnp.float32).reshape(1, N)

    # --- explicit VMEM budget ---
    need = _estimate_vmem_bytes(TB, TT, T_pad, H, N)
    vmem_limit = int(need * 1.25)
    vmem_limit = max(vmem_limit, 32 << 20)
    vmem_limit = min(vmem_limit, vmem_cap - (4 << 20))
    vmem_limit = max(vmem_limit, 16 << 20)

    grid_spec = pltpu.PrefetchScalarGridSpec(
        num_scalar_prefetch=0,
        grid=(nb, nt),
        in_specs=[
            pl.BlockSpec((TB, TT, H), lambda bi, ti: (bi, ti, 0)),
            pl.BlockSpec((TB, TT),    lambda bi, ti: (bi, ti)),
            pl.BlockSpec((H, H),      lambda bi, ti: (0, 0)),
            pl.BlockSpec((1, H),      lambda bi, ti: (0, 0)),
            pl.BlockSpec((H, N),      lambda bi, ti: (0, 0)),
            pl.BlockSpec((1, N),      lambda bi, ti: (0, 0)),
        ],
        out_specs=(
            pl.BlockSpec((TB, H),     lambda bi, ti: (bi, 0)),
            pl.BlockSpec((TB, T_pad), lambda bi, ti: (bi, 0)),
            pl.BlockSpec((TB, TT, N), lambda bi, ti: (bi, ti, 0)),
        ),
        scratch_shapes=[
            pltpu.VMEM((TB, 1), jnp.float32),   # running max
            pltpu.VMEM((TB, 1), jnp.float32),   # running denom
            pltpu.VMEM((TB, H), jnp.float32),   # weighted-sum accumulator
        ],
    )

    utter, attw, blse = pl.pallas_call(
        _attn_lse_pool_kernel,
        grid_spec=grid_spec,
        out_shape=(
            jax.ShapeDtypeStruct((B_pad, H), jnp.float32),
            jax.ShapeDtypeStruct((B_pad, T_pad), jnp.float32),
            jax.ShapeDtypeStruct((B_pad, T_pad, N), jnp.float32),
        ),
        compiler_params=pltpu.CompilerParams(
            dimension_semantics=("parallel", "arbitrary"),
            vmem_limit_bytes=vmem_limit),
    )(x, mask, wa_bf, ba_f, w_bf, bw_f)

    # strip the padding back off
    utter = utter[:B]
    attw = attw[:B, :T]
    blse = blse[:B, :T]
    return utter, attw[..., None], blse


# ----------------------------------------------------------------------------
# Reference + test
# ----------------------------------------------------------------------------
def _init_linear(key, fan_in, fan_out):
    # torch.nn.Linear-style init: uniform(-1/sqrt(fan_in), 1/sqrt(fan_in)).
    kw, kb = jax.random.split(key)
    bound = 1.0 / (fan_in ** 0.5)
    wgt = jax.random.uniform(kw, (fan_in, fan_out), jnp.float32, -bound, bound)
    bias = jax.random.uniform(kb, (1, fan_out), jnp.float32, -bound, bound)
    return wgt, bias


def _reference(batch_rep, att_mask, wa, ba, w, bw):
    # Pure-JAX f32 reference mirroring the torch forward.
    h1 = jnp.maximum(jnp.einsum("bth,hd->btd", batch_rep, wa) + ba, 0.0)
    blse = jnp.einsum("btd,dn->btn", h1, w) + bw                  # [B, T, N]
    lse = jax.scipy.special.logsumexp(blse, axis=-1)              # [B, T]
    att = att_mask + lse
    att_w = jax.nn.softmax(att, axis=-1)                          # [B, T]
    utter = jnp.einsum("bth,bt->bh", batch_rep, att_w)            # [B, H]
    return utter, att_w[..., None], blse


def _run_case(key, B, T, H, nheads, valid_len, block_t=None):
    k_x, k_wa, k_w = jax.random.split(key, 3)
    batch_rep = jax.random.normal(k_x, (B, T, H), jnp.float32)
    valid_len = jnp.asarray(valid_len, dtype=jnp.int32)
    att_mask = jnp.where(jnp.arange(T)[None, :] < valid_len[:, None],
                         0.0, -1e9).astype(jnp.float32)
    wa, ba = _init_linear(k_wa, H, H)          # W_a: Linear(H, H)
    w, bw = _init_linear(k_w, H, nheads)       # W  : Linear(H, nheads)

    utter, att_w, blse = attentive_lse_pooling(
        batch_rep, att_mask, wa, ba, w, bw, block_t=block_t)
    utter = jax.block_until_ready(utter)
    att_w = jax.block_until_ready(att_w)
    blse = jax.block_until_ready(blse)

    ref_utter, ref_w, ref_blse = _reference(batch_rep, att_mask, wa, ba, w, bw)

    assert utter.shape == (B, H)
    assert att_w.shape == (B, T, 1)
    assert blse.shape == (B, T, nheads)
    # Tolerances accommodate the bf16 MXU operands (f32 accumulation).
    assert jnp.allclose(blse, ref_blse, atol=3e-2, rtol=3e-2), "att_logits_before_lse mismatch"
    assert jnp.allclose(att_w, ref_w, atol=3e-2, rtol=3e-2), "att_w mismatch"
    assert jnp.allclose(utter, ref_utter, atol=3e-2, rtol=3e-2), "utter_rep mismatch"


if __name__ == "__main__":
    key0, key1 = jax.random.split(jax.random.PRNGKey(0), 2)

    # Small single-tile case (matches the module's typical small-shape usage).
    _run_case(key0, B=2, T=8, H=32, nheads=4, valid_len=[8, 5])

    # Exercise the padded / multi-T-tile online-softmax path (T=300 -> padded
    # to 384 and split into three 128-frame tiles).
    _run_case(key1, B=2, T=300, H=64, nheads=4, valid_len=[300, 211], block_t=128)

    print("KERNEL_OK")
</pallas_src>

<mosaic_0001>
module attributes {stable_mosaic.version = 11 : i64} {
  func.func @_attn_lse_pool_kernel(%arg0: i32, %arg1: i32, %arg2: memref<2x8x32xbf16, #tpu.memory_space<vmem>>, %arg3: memref<2x8xf32, #tpu.memory_space<vmem>>, %arg4: memref<32x32xbf16, #tpu.memory_space<vmem>>, %arg5: memref<1x32xf32, #tpu.memory_space<vmem>>, %arg6: memref<32x4xbf16, #tpu.memory_space<vmem>>, %arg7: memref<1x4xf32, #tpu.memory_space<vmem>>, %arg8: memref<2x32xf32, #tpu.memory_space<vmem>>, %arg9: memref<2x8xf32, #tpu.memory_space<vmem>>, %arg10: memref<2x8x4xf32, #tpu.memory_space<vmem>>, %arg11: memref<2x1xf32, #tpu.memory_space<vmem>>, %arg12: memref<2x1xf32, #tpu.memory_space<vmem>>, %arg13: memref<2x32xf32, #tpu.memory_space<vmem>>) attributes {dimension_semantics = [#tpu.dimension_semantics<parallel>, #tpu.dimension_semantics<arbitrary>], iteration_bounds = array<i64: 1, 1>, scalar_prefetch = 0 : i64, scratch_operands = 3 : i64, tpu.core_type = #tpu.core_type<tc>, window_params = [{transform_indices = @transform_0, window_bounds = array<i64: 2, 8, 32>}, {transform_indices = @transform_1, window_bounds = array<i64: 2, 8>}, {pipeline_mode = #tpu.pipeline_mode<synchronous>, transform_indices = @transform_2, window_bounds = array<i64: 32, 32>}, {pipeline_mode = #tpu.pipeline_mode<synchronous>, transform_indices = @transform_3, window_bounds = array<i64: 1, 32>}, {pipeline_mode = #tpu.pipeline_mode<synchronous>, transform_indices = @transform_4, window_bounds = array<i64: 32, 4>}, {pipeline_mode = #tpu.pipeline_mode<synchronous>, transform_indices = @transform_5, window_bounds = array<i64: 1, 4>}, {transform_indices = @transform_6, window_bounds = array<i64: 2, 32>}, {transform_indices = @transform_7, window_bounds = array<i64: 2, 8>}, {transform_indices = @transform_8, window_bounds = array<i64: 2, 8, 4>}]} {
    %c0_i32 = arith.constant 0 : i32
    %0 = arith.cmpi eq, %arg1, %c0_i32 : i32
    %1 = arith.extui %0 : i1 to i32
    %c0_i32_0 = arith.constant 0 : i32
    %2 = arith.cmpi ne, %1, %c0_i32_0 : i32
    scf.if %2 {
      %cst_39 = arith.constant 0xFF800000 : f32
      %60 = vector.broadcast %cst_39 : f32 to vector<2x1xf32>
      %c0_40 = arith.constant 0 : index
      %c0_41 = arith.constant 0 : index
      %61 = vector.load %arg11[%c0_40, %c0_41] : memref<2x1xf32, #tpu.memory_space<vmem>>, vector<2x1xf32>
      tpu.vector_store %arg11[%c0_40, %c0_41], %60 {strides = array<i32>} : memref<2x1xf32, #tpu.memory_space<vmem>>, vector<2x1xf32>,
      %cst_42 = arith.constant 0.000000e+00 : f32
      %62 = vector.broadcast %cst_42 : f32 to vector<2x1xf32>
      %c0_43 = arith.constant 0 : index
      %c0_44 = arith.constant 0 : index
      %63 = vector.load %arg12[%c0_43, %c0_44] : memref<2x1xf32, #tpu.memory_space<vmem>>, vector<2x1xf32>
      tpu.vector_store %arg12[%c0_43, %c0_44], %62 {strides = array<i32>} : memref<2x1xf32, #tpu.memory_space<vmem>>, vector<2x1xf32>,
      %cst_45 = arith.constant 0.000000e+00 : f32
      %64 = vector.broadcast %cst_45 : f32 to vector<2x32xf32>
      %c0_46 = arith.constant 0 : index
      %c0_47 = arith.constant 0 : index
      %65 = vector.load %arg13[%c0_46, %c0_47] : memref<2x32xf32, #tpu.memory_space<vmem>>, vector<2x32xf32>
      tpu.vector_store %arg13[%c0_46, %c0_47], %64 {strides = array<i32>} : memref<2x32xf32, #tpu.memory_space<vmem>>, vector<2x32xf32>,
    } else {
    }
    %c0 = arith.constant 0 : index
    %c0_1 = arith.constant 0 : index
    %c0_2 = arith.constant 0 : index
    %3 = vector.load %arg2[%c0, %c0_1, %c0_2] : memref<2x8x32xbf16, #tpu.memory_space<vmem>>, vector<2x8x32xbf16>
    %4 = vector.shape_cast %3 : vector<2x8x32xbf16> to vector<16x32xbf16>
    %c0_3 = arith.constant 0 : index
    %c0_4 = arith.constant 0 : index
    %5 = vector.load %arg4[%c0_3, %c0_4] : memref<32x32xbf16, #tpu.memory_space<vmem>>, vector<32x32xbf16>
    %cst = arith.constant dense<0.000000e+00> : vector<16x32xf32>
    %6 = tpu.matmul %4, %5, %cst {dimension_numbers = #tpu.dot_dimension_numbers<[1], [0], [0], [1], [0, 0, 1, 1], [], []>} : vector<16x32xbf16>, vector<32x32xbf16>, vector<16x32xf32> -> vector<16x32xf32>
    %c0_5 = arith.constant 0 : index
    %c0_6 = arith.constant 0 : index
    %7 = vector.load %arg5[%c0_5, %c0_6] : memref<1x32xf32, #tpu.memory_space<vmem>>, vector<1x32xf32>
    %8 = vector.broadcast %7 : vector<1x32xf32> to vector<16x32xf32>
    %9 = arith.addf %6, %8 : vector<16x32xf32>
    %cst_7 = arith.constant 0.000000e+00 : f32
    %10 = vector.broadcast %cst_7 : f32 to vector<16x32xf32>
    %11 = arith.maximumf %9, %10 : vector<16x32xf32>
    %12 = arith.truncf %11 : vector<16x32xf32> to vector<16x32xbf16>
    %c0_8 = arith.constant 0 : index
    %c0_9 = arith.constant 0 : index
    %13 = vector.load %arg6[%c0_8, %c0_9] : memref<32x4xbf16, #tpu.memory_space<vmem>>, vector<32x4xbf16>
    %cst_10 = arith.constant dense<0.000000e+00> : vector<16x4xf32>
    %14 = tpu.matmul %12, %13, %cst_10 {dimension_numbers = #tpu.dot_dimension_numbers<[1], [0], [0], [1], [0, 0, 1, 1], [], []>} : vector<16x32xbf16>, vector<32x4xbf16>, vector<16x4xf32> -> vector<16x4xf32>
    %c0_11 = arith.constant 0 : index
    %c0_12 = arith.constant 0 : index
    %15 = vector.load %arg7[%c0_11, %c0_12] : memref<1x4xf32, #tpu.memory_space<vmem>>, vector<1x4xf32>
    %16 = vector.broadcast %15 : vector<1x4xf32> to vector<16x4xf32>
    %17 = arith.addf %14, %16 : vector<16x4xf32>
    %18 = vector.shape_cast %17 : vector<16x4xf32> to vector<2x8x4xf32>
    %c0_13 = arith.constant 0 : index
    %c0_14 = arith.constant 0 : index
    %c0_15 = arith.constant 0 : index
    %19 = vector.load %arg10[%c0_13, %c0_14, %c0_15] : memref<2x8x4xf32, #tpu.memory_space<vmem>>, vector<2x8x4xf32>
    tpu.vector_store %arg10[%c0_13, %c0_14, %c0_15], %18 {strides = array<i32>} : memref<2x8x4xf32, #tpu.memory_space<vmem>>, vector<2x8x4xf32>,
    %cst_16 = arith.constant dense<0xFF800000> : vector<2x8xf32>
    %20 = vector.multi_reduction <maximumf>, %18, %cst_16 [2] : vector<2x8x4xf32> to vector<2x8xf32>
    %21 = vector.shape_cast %20 : vector<2x8xf32> to vector<2x8x1xf32>
    %22 = vector.broadcast %21 : vector<2x8x1xf32> to vector<2x8x4xf32>
    %23 = arith.subf %18, %22 : vector<2x8x4xf32>
    %24 = math.exp %23 : vector<2x8x4xf32>
    %cst_17 = arith.constant dense<0.000000e+00> : vector<2x8xf32>
    %25 = vector.multi_reduction <add>, %24, %cst_17 [2] : vector<2x8x4xf32> to vector<2x8xf32>
    %26 = math.log %25 : vector<2x8xf32>
    %27 = arith.addf %20, %26 : vector<2x8xf32>
    %c0_18 = arith.constant 0 : index
    %c0_19 = arith.constant 0 : index
    %28 = vector.load %arg3[%c0_18, %c0_19] : memref<2x8xf32, #tpu.memory_space<vmem>>, vector<2x8xf32>
    %29 = arith.addf %27, %28 : vector<2x8xf32>
    %c0_20 = arith.constant 0 : index
    %c0_21 = arith.constant 0 : index
    %30 = vector.load %arg9[%c0_20, %c0_21] : memref<2x8xf32, #tpu.memory_space<vmem>>, vector<2x8xf32>
    tpu.vector_store %arg9[%c0_20, %c0_21], %29 {strides = array<i32>} : memref<2x8xf32, #tpu.memory_space<vmem>>, vector<2x8xf32>,
    %c0_22 = arith.constant 0 : index
    %c0_23 = arith.constant 0 : index
    %31 = vector.load %arg11[%c0_22, %c0_23] : memref<2x1xf32, #tpu.memory_space<vmem>>, vector<2x1xf32>
    %cst_24 = arith.constant dense<0xFF800000> : vector<2xf32>
    %32 = vector.multi_reduction <maximumf>, %29, %cst_24 [1] : vector<2x8xf32> to vector<2xf32>
    %33 = vector.shape_cast %32 : vector<2xf32> to vector<2x1xf32>
    %34 = arith.maximumf %31, %33 : vector<2x1xf32>
    %35 = arith.subf %31, %34 : vector<2x1xf32>
    %36 = math.exp %35 : vector<2x1xf32>
    %37 = vector.broadcast %34 : vector<2x1xf32> to vector<2x8xf32>
    %38 = arith.subf %29, %37 : vector<2x8xf32>
    %39 = math.exp %38 : vector<2x8xf32>
    %c0_25 = arith.constant 0 : index
    %c0_26 = arith.constant 0 : index
    %40 = vector.load %arg12[%c0_25, %c0_26] : memref<2x1xf32, #tpu.memory_space<vmem>>, vector<2x1xf32>
    %41 = arith.mulf %36, %40 : vector<2x1xf32>
    %cst_27 = arith.constant dense<0.000000e+00> : vector<2xf32>
    %42 = vector.multi_reduction <add>, %39, %cst_27 [1] : vector<2x8xf32> to vector<2xf32>
    %43 = vector.shape_cast %42 : vector<2xf32> to vector<2x1xf32>
    %44 = arith.addf %41, %43 : vector<2x1xf32>
    %c0_28 = arith.constant 0 : index
    %c0_29 = arith.constant 0 : index
    %45 = vector.load %arg12[%c0_28, %c0_29] : memref<2x1xf32, #tpu.memory_space<vmem>>, vector<2x1xf32>
    tpu.vector_store %arg12[%c0_28, %c0_29], %44 {strides = array<i32>} : memref<2x1xf32, #tpu.memory_space<vmem>>, vector<2x1xf32>,
    %c0_30 = arith.constant 0 : index
    %c0_31 = arith.constant 0 : index
    %46 = vector.load %arg13[%c0_30, %c0_31] : memref<2x32xf32, #tpu.memory_space<vmem>>, vector<2x32xf32>
    %47 = vector.broadcast %36 : vector<2x1xf32> to vector<2x32xf32>
    %48 = arith.mulf %47, %46 : vector<2x32xf32>
    %49 = arith.extf %3 : vector<2x8x32xbf16> to vector<2x8x32xf32>
    %50 = vector.shape_cast %39 : vector<2x8xf32> to vector<2x8x1xf32>
    %51 = vector.broadcast %50 : vector<2x8x1xf32> to vector<2x8x32xf32>
    %52 = arith.mulf %49, %51 : vector<2x8x32xf32>
    %cst_32 = arith.constant dense<0.000000e+00> : vector<2x32xf32>
    %53 = vector.multi_reduction <add>, %52, %cst_32 [1] : vector<2x8x32xf32> to vector<2x32xf32>
    %54 = arith.addf %48, %53 : vector<2x32xf32>
    %c0_33 = arith.constant 0 : index
    %c0_34 = arith.constant 0 : index
    %55 = vector.load %arg13[%c0_33, %c0_34] : memref<2x32xf32, #tpu.memory_space<vmem>>, vector<2x32xf32>
    tpu.vector_store %arg13[%c0_33, %c0_34], %54 {strides = array<i32>} : memref<2x32xf32, #tpu.memory_space<vmem>>, vector<2x32xf32>,
    %c0_35 = arith.constant 0 : index
    %c0_36 = arith.constant 0 : index
    %56 = vector.load %arg11[%c0_35, %c0_36] : memref<2x1xf32, #tpu.memory_space<vmem>>, vector<2x1xf32>
    tpu.vector_store %arg11[%c0_35, %c0_36], %34 {strides = array<i32>} : memref<2x1xf32, #tpu.memory_space<vmem>>, vector<2x1xf32>,
    %c0_i32_37 = arith.constant 0 : i32
    %57 = arith.cmpi eq, %arg1, %c0_i32_37 : i32
    %58 = arith.extui %57 : i1 to i32
    %c0_i32_38 = arith.constant 0 : i32
    %59 = arith.cmpi ne, %58, %c0_i32_38 : i32
    scf.if %59 {
      %c0_39 = arith.constant 0 : index
      %c0_40 = arith.constant 0 : index
      %60 = vector.load %arg12[%c0_39, %c0_40] : memref<2x1xf32, #tpu.memory_space<vmem>>, vector<2x1xf32>
      %61 = tpu.reciprocal %60 : vector<2x1xf32> -> vector<2x1xf32>
      %c0_41 = arith.constant 0 : index
      %c0_42 = arith.constant 0 : index
      %62 = vector.load %arg13[%c0_41, %c0_42] : memref<2x32xf32, #tpu.memory_space<vmem>>, vector<2x32xf32>
      %63 = vector.broadcast %61 : vector<2x1xf32> to vector<2x32xf32>
      %64 = arith.mulf %62, %63 : vector<2x32xf32>
      %c0_43 = arith.constant 0 : index
      %c0_44 = arith.constant 0 : index
      %65 = vector.load %arg8[%c0_43, %c0_44] : memref<2x32xf32, #tpu.memory_space<vmem>>, vector<2x32xf32>
      tpu.vector_store %arg8[%c0_43, %c0_44], %64 {strides = array<i32>} : memref<2x32xf32, #tpu.memory_space<vmem>>, vector<2x32xf32>,
      %c0_45 = arith.constant 0 : index
      %c0_46 = arith.constant 0 : index
      %66 = vector.load %arg9[%c0_45, %c0_46] : memref<2x8xf32, #tpu.memory_space<vmem>>, vector<2x8xf32>
      %c0_47 = arith.constant 0 : index
      %c0_48 = arith.constant 0 : index
      %67 = vector.load %arg11[%c0_47, %c0_48] : memref<2x1xf32, #tpu.memory_space<vmem>>, vector<2x1xf32>
      %68 = vector.broadcast %67 : vector<2x1xf32> to vector<2x8xf32>
      %69 = arith.subf %66, %68 : vector<2x8xf32>
      %70 = math.exp %69 : vector<2x8xf32>
      %71 = vector.broadcast %61 : vector<2x1xf32> to vector<2x8xf32>
      %72 = arith.mulf %70, %71 : vector<2x8xf32>
      %c0_49 = arith.constant 0 : index
      %c0_50 = arith.constant 0 : index
      %73 = vector.load %arg9[%c0_49, %c0_50] : memref<2x8xf32, #tpu.memory_space<vmem>>, vector<2x8xf32>
      tpu.vector_store %arg9[%c0_49, %c0_50], %72 {strides = array<i32>} : memref<2x8xf32, #tpu.memory_space<vmem>>, vector<2x8xf32>,
    } else {
    }
    return
  }
  func.func @transform_0(%arg0: i32, %arg1: i32) -> (i32, i32, i32) {
    %c0_i32 = arith.constant 0 : i32
    %c0_i32_0 = arith.constant 0 : i32
    return %arg0, %arg1, %c0_i32 : i32, i32, i32
  }
  func.func @transform_1(%arg0: i32, %arg1: i32) -> (i32, i32) {
    %c0_i32 = arith.constant 0 : i32
    return %arg0, %arg1 : i32, i32
  }
  func.func @transform_2(%arg0: i32, %arg1: i32) -> (i32, i32) {
    %c0_i32 = arith.constant 0 : i32
    %c0_i32_0 = arith.constant 0 : i32
    %c0_i32_1 = arith.constant 0 : i32
    return %c0_i32, %c0_i32_0 : i32, i32
  }
  func.func @transform_3(%arg0: i32, %arg1: i32) -> (i32, i32) {
    %c0_i32 = arith.constant 0 : i32
    %c0_i32_0 = arith.constant 0 : i32
    %c0_i32_1 = arith.constant 0 : i32
    return %c0_i32, %c0_i32_0 : i32, i32
  }
  func.func @transform_4(%arg0: i32, %arg1: i32) -> (i32, i32) {
    %c0_i32 = arith.constant 0 : i32
    %c0_i32_0 = arith.constant 0 : i32
    %c0_i32_1 = arith.constant 0 : i32
    return %c0_i32, %c0_i32_0 : i32, i32
  }
  func.func @transform_5(%arg0: i32, %arg1: i32) -> (i32, i32) {
    %c0_i32 = arith.constant 0 : i32
    %c0_i32_0 = arith.constant 0 : i32
    %c0_i32_1 = arith.constant 0 : i32
    return %c0_i32, %c0_i32_0 : i32, i32
  }
  func.func @transform_6(%arg0: i32, %arg1: i32) -> (i32, i32) {
    %c0_i32 = arith.constant 0 : i32
    %c0_i32_0 = arith.constant 0 : i32
    return %arg0, %c0_i32 : i32, i32
  }
  func.func @transform_7(%arg0: i32, %arg1: i32) -> (i32, i32) {
    %c0_i32 = arith.constant 0 : i32
    %c0_i32_0 = arith.constant 0 : i32
    return %arg0, %c0_i32 : i32, i32
  }
  func.func @transform_8(%arg0: i32, %arg1: i32) -> (i32, i32, i32) {
    %c0_i32 = arith.constant 0 : i32
    %c0_i32_0 = arith.constant 0 : i32
    return %arg0, %arg1, %c0_i32 : i32, i32, i32
  }
}

</mosaic_0001>

<bundles_post_ra>
// kernel: tpu_custom_call.1
= control target key start
LH: loop header
LB: loop body
LE: loop exit
PB: predicated region body
PF: predicated region fallthrough
CT: control target
= control target key end

     0   :  { %14 = vsyncpa [#allocation6], 0  ;;  %s605_s0 = inlined_call_operand.hbm [shape: bf16[2,8,32], index: 0, kind: input, shape index: {}]   ;;  %s606_s1 = inlined_call_operand.vmem [shape: f32[2,8], index: 1, kind: input, shape index: {}]   ;;  %s607_s2 = inlined_call_operand.vmem [shape: bf16[32,32], index: 2, kind: input, shape index: {}]   ;;  %s608_s3 = inlined_call_operand.vmem [shape: f32[1,32], index: 3, kind: input, shape index: {}]   ;;  %s609_s4 = inlined_call_operand.vmem [shape: bf16[32,4], index: 4, kind: input, shape index: {}]   ;;  %s610_s5 = inlined_call_operand.vmem [shape: f32[1,4], index: 5, kind: input, shape index: {}]   ;;  %s611_s6 = inlined_call_operand.hbm [shape: f32[2,32], index: 6, kind: output, shape index: {0}]   ;;  %s612_s7 = inlined_call_operand.hbm [shape: f32[2,8], index: 7, kind: output, shape index: {1}]   ;;  %s613_s8 = inlined_call_operand.vmem [shape: f32[2,8,4], index: 8, kind: output, shape index: {2}]  }
   0x1   :  { %15 = vsyncpa [#allocation7], 0 }
   0x2   :  { %16 = vsyncpa [#allocation10], 0  ;;  %s21_s29 = sshll.u32 %s605_s0, 4  ;;  %s492_s30 = smov [#allocation5]   ;;  %s22_s29 = int_to_ptr.hbm [resolvable:$true] %s21_s29 }
   0x3   :  { %s23_s9 = sshll.u32 %s492_s30, 4  ;;  %s493_s10 = smov 64   ;;  %s24_s9 = int_to_ptr.vmem [resolvable:$true] %s23_s9 }
   0x4   :  { %s494_s11 = smov 4  }
   0x5   :  { %29 = dma.hbm_to_vmem [thread:$0]  %s22_s29, 128, %s24_s9, [#allocation6], %s493_s10, %s493_s10, %s494_s11  }
   0x6   :  { %486 = dma.done.wait [#allocation6], 128  }
   0x7   :  { %487 = vsyncadd [#allocation6], 4294967168  ;;  %v379_v0 = vld [vmem:[%s607_s2 + $0x8] sm:$0xff]  ;;  %v378_v1 = vld [vmem:[%s607_s2] sm:$0xff]  ;;  %vm81_vm0 = vcmask 261120   ;;  %vm139_vm1 = vcmask 31744   ;;  %v169_v20 = vlaneseq }
   0x8   :  { %91 = vmatpush.bf16.msra.mxu0 %v379_v0  ;;  %v377_v2 = vld [vmem:[#allocation5] sm:$0xff]  ;;  %v394_v6 = vld [vmem:[%s608_s3] ss:$0 sm:$0xff]  ;;  %v495_v35 = vmov 0   ;;  %vm49_vm2 = vcmask 1024   ;;  %v496_v48 = vmov -inf  }
   0x9   :  { %v381_v3 = vld [vmem:[%s609_s4 + $0x8] sm:$0xff]  ;;  %v380_v4 = vld [vmem:[%s609_s4] sm:$0xff]  ;;  %v170_v21 = vshrl.u32 %v169_v20, 7  ;;  %391 = vset.pattern.permute.xlu0 %v495_v35  ;;  %392 = vset.pattern.permute.xlu1 %v495_v35  ;;  %50 = vst.msk [vmem:[#allocation2] sm:$0x3] %vm49_vm2, %v496_v48  ;;  %v195_v49 = vand.u32 127, %v169_v20 }
   0xa   :  { %131 = vmatpush.bf16.msra.mxu1 %v381_v3  ;;  %v395_v13 = vld [vmem:[%s610_s5] ss:$0 sm:$0xff]  ;;  %vm198_vm3 = vcmask 1041409   ;;  %vm201_vm4 = vcmask 58368   ;;  %v497_v56 = vmov 0.0   ;;  %vm52_vm5 = vcmask 254976  }
   0xb   :  { %390 = vset.pattern.permute.xlu2 %v170_v21  ;;  %v166_v22 = vld [vmem:[%s606_s1] sm:$0x3]  ;;  %51 = vst.msk [vmem:[#allocation3] sm:$0x3] %vm49_vm2, %v497_v56  ;;  %s498_s1 = smov [#allocation8]   ;;  %s325_s27 = sshll.u32 %s611_s6, 4  ;;  %s326_s27 = int_to_ptr.hbm [resolvable:$true] %s325_s27 }
   0xc   :  { %92 = vmatpush.bf16.msra.mxu0 %v378_v1  ;;  %v168_v23 = vperm.slane %v166_v22, 0  ;;  %v175_v27 = vperm.slane %v166_v22, 1  ;;  %53 = vst.msk [vmem:[#allocation4] sm:$0x3] %vm52_vm5, %v497_v56  ;;  %s499_s28 = smov [#allocation9]   ;;  %s336_s10 = sshll.u32 %s612_s7, 4  ;;  %s337_s10 = int_to_ptr.hbm [resolvable:$true] %s336_s10 }
   0xd   :  { %s334_s29 = sshll.u32 %s499_s28, 4  ;;  %s335_s29 = int_to_ptr.vmem [resolvable:$true] %s334_s29 }
   0xe   :  { %132 = vmatpush.bf16.msra.mxu1 %v380_v4 }
   0xf   :  { %367 = vmatmul.msk.bf16.vlgmr.msra.gmra.mxu0 %vm81_vm0, %v377_v2 }
  0x10   :  { %v203_v57 = vld [vmem:[#allocation2] sm:$0x3] }
  0x13   :  { %173 = vperm.xlu2 %390, %v168_v23  }
  0x1b   :  { %180 = vperm.xlu2 %390, %v175_v27  }
  0x23   :  { %393 = vset.pattern.permute.xlu2 %v495_v35 }
  0x6d   :  { %v174_v40 = vpop.permute.xlu2 %173 }
  0x75   :  { %v181_v46 = vpop.permute.xlu2 %180 }
  0x8c   :  { %v94_v5 = vpop.f32.mrf.mxu0 }
  0x8d   :  { %v95_v7 = vadd.f32 %v394_v6, %v94_v5 }
  0x8f   :  { %v99_v10 = vmax.f32 %v95_v7, 0.0 }
  0x94   :  { %v96_v8 = vpop.f32.mrf.mxu0 }
  0x95   :  { %v97_v9 = vadd.f32 %v394_v6, %v96_v8 }
  0x97   :  { %v100_v11 = vmax.f32 %v97_v9, 0.0  ;;  %v55_v9 = vld [vmem:[#allocation5] sm:$0xff]  }
  0x99   :  { %v101_v12 = vpack.c.bf16 %v100_v11, %v99_v10  ;;  %v252_v10 = vunpack.c.l.bf16 %v55_v9  ;;  %v253_v11 = vunpack.c.h.bf16 %v55_v9 }
  0x9b   :  { %376 = vmatmul.msk.bf16.vlgmr.msra.gmra.mxu1 %vm81_vm0, %v101_v12 }
 0x118   :  { %v134_v14 = vpop.f32.mrf.mxu1 }
 0x119   :  { %v135_v15 = vadd.f32 %v395_v13, %v134_v14 }
 0x11b   :  { %140 = vst.msk [vmem:[%s613_s8] sm:$0xff] %vm139_vm1, %v135_v15  ;;  %v142_v16 = vsel %vm139_vm1, %v135_v15, -inf }
 0x11c   :  { %143 = vmax.xlane.f32.xlu0 %v142_v16 }
 0x120   :  { %v136_v17 = vpop.f32.mrf.mxu1 }
 0x121   :  { %v137_v18 = vadd.f32 %v395_v13, %v136_v17 }
 0x123   :  { %141 = vst.msk [vmem:[%s613_s8 + $0x8] sm:$0xff] %vm139_vm1, %v137_v18  ;;  %v145_v19 = vsel %vm139_vm1, %v137_v18, -inf  ;;  %s323_s8 = sshll.u32 %s498_s1, 4  ;;  %s324_s8 = int_to_ptr.vmem [resolvable:$true] %s323_s8 }
 0x124   :  { %146 = vmax.xlane.f32.xlu0 %v145_v19 }
 0x18f   :  { %v144_v24 = vpop.xlane.xlu0 %143 }
 0x190   :  { %v148_v25 = vsub.f32 %v135_v15, %v144_v24 }
 0x192   :  { %v150_v26 = vmul.f32 1.442695, %v148_v25 }
 0x194   :  { %396 = vpow2.f32 %v150_v26 }
 0x197   :  { %v147_v28 = vpop.xlane.xlu0 %146 }
 0x198   :  { %v149_v29 = vsub.f32 %v137_v18, %v147_v28 }
 0x19a   :  { %v397_v30 = vpop.eup %396  ;;  %v152_v31 = vmul.f32 1.442695, %v149_v29 }
 0x19b   :  { %v154_v32 = vsel %vm139_vm1, %v397_v30, 0.0 }
 0x19c   :  { %398 = vpow2.f32 %v152_v31  ;;  %155 = vadd.xlane.f32.xlu1 %v154_v32  ;;  %v245_v31 = vld [vmem:[#allocation4] sm:$0x3] }
 0x1a2   :  { %v399_v33 = vpop.eup %398 }
 0x1a3   :  { %v157_v34 = vsel %vm139_vm1, %v399_v33, 0.0 }
 0x1a4   :  { %158 = vadd.xlane.f32.xlu1 %v157_v34 }
 0x20f   :  { %v156_v36 = vpop.xlane.xlu1 %155 }
 0x210   :  { %400 = vlog2.f32 %v156_v36 }
 0x216   :  { %v401_v37 = vpop.eup %400 }
 0x217   :  { %v161_v38 = vmul.f32 0.6931472, %v401_v37  ;;  %v159_v39 = vpop.xlane.xlu1 %158 }
 0x218   :  { %402 = vlog2.f32 %v159_v39  ;;  %v225_v39 = vld [vmem:[#allocation3] sm:$0x3] }
 0x219   :  { %v164_v41 = vadd.f32 %v161_v38, %v144_v24 }
 0x21b   :  { %v184_v42 = vadd.f32 %v174_v40, %v164_v41 }
 0x21d   :  { %189 = vperm.xlu0 %391, %v184_v42  }
 0x21e   :  { %v403_v43 = vpop.eup %402 }
 0x21f   :  { %v163_v44 = vmul.f32 0.6931472, %v403_v43 }
 0x221   :  { %v165_v45 = vadd.f32 %v163_v44, %v147_v28 }
 0x223   :  { %v185_v47 = vadd.f32 %v181_v46, %v165_v45 }
 0x225   :  { %192 = vperm.xlu1 %392, %v185_v47  }
 0x28f   :  { %v190_v50 = vpop.permute.xlu0 %189 }
 0x290   :  { %v196_v52 = vperm.slane %v190_v50, %v195_v49 }
 0x297   :  { %v193_v51 = vpop.permute.xlu1 %192 }
 0x298   :  { %v197_v53 = vperm.slane %v193_v51, %v195_v49 }
 0x29a   :  { %v199_v54 = vsel %vm198_vm3, %v197_v53, %v196_v52 }
 0x29b   :  { %v204_v55 = vsel %vm201_vm4, %v199_v54, -inf  ;;  %202 = vst.msk [vmem:[#allocation9] sm:$0x3] %vm201_vm4, %v199_v54 }
 0x29c   :  { %205 = vmax.xlane.f32.xlu2 %v204_v55 }
 0x2a2   :  { %v306_v55 = vld [vmem:[#allocation9] sm:$0x3] }
 0x30f   :  { %v206_v58 = vpop.xlane.xlu2 %205 }
 0x310   :  { %v207_v59 = vmax.f32 %v203_v57, %v206_v58 }
 0x312   :  { %v208_v60 = vsub.f32 %v203_v57, %v207_v59  ;;  %279 = vst.msk [vmem:[#allocation2] sm:$0x3] %vm49_vm2, %v207_v59  ;;  %213 = vperm.xlu1 %392, %v207_v59  }
 0x314   :  { %v209_v61 = vmul.f32 1.442695, %v208_v60 }
 0x316   :  { %404 = vpow2.f32 %v209_v61 }
 0x319   :  { %v307_v8 = vld [vmem:[#allocation2] sm:$0x3] }
 0x31c   :  { %v405_v62 = vpop.eup %404 }
 0x31d   :  { %248 = vperm.xlu2 %393, %v405_v62   ;;  %v226_v40 = vmul.f32 %v405_v62, %v225_v39 }
 0x377   :  { %v249_v32 = vpop.permute.xlu2 %248 }
 0x378   :  { %v251_v36 = vmul.f32 %v249_v32, %v245_v31 }
 0x384   :  { %v214_v63 = vpop.permute.xlu1 %213 }
 0x385   :  { %v215_v0 = vperm.slane %v214_v63, 0  ;;  %v216_v1 = vperm.slane %v214_v63, 1 }
 0x387   :  { %v219_v2 = vsub.f32 %v184_v42, %v215_v0  ;;  %v220_v3 = vsub.f32 %v185_v47, %v216_v1 }
 0x389   :  { %v221_v4 = vmul.f32 1.442695, %v219_v2  ;;  %v223_v5 = vmul.f32 1.442695, %v220_v3 }
 0x38b   :  { %406 = vpow2.f32 %v221_v4 }
 0x38c   :  { %408 = vpow2.f32 %v223_v5 }
 0x391   :  { %v407_v6 = vpop.eup %406 }
 0x392   :  { %v409_v7 = vpop.eup %408  ;;  %230 = vperm.xlu1 %392, %v407_v6  }
 0x393   :  { %233 = vperm.xlu0 %391, %v409_v7  }
 0x39b   :  { %310 = vperm.xlu0 %391, %v307_v8  }
 0x404   :  { %v231_v12 = vpop.permute.xlu1 %230 }
 0x405   :  { %v234_v13 = vpop.permute.xlu0 %233  ;;  %v235_v14 = vperm.slane %v231_v12, %v195_v49  ;;  %v256_v15 = vmul.f32 %v252_v10, %v231_v12 }
 0x406   :  { %v236_v16 = vperm.slane %v234_v13, %v195_v49  ;;  %v257_v17 = vmul.f32 %v253_v11, %v234_v13 }
 0x407   :  { %v258_v18 = vsel %vm81_vm0, %v256_v15, 0.0 }
 0x408   :  { %v265_v19 = vsel %vm81_vm0, %v257_v17, 0.0  ;;  %v259_v20 = vrot.slane %v258_v18, 4  ;;  %v237_v21 = vsel %vm198_vm3, %v236_v16, %v235_v14 }
 0x409   :  { %v266_v22 = vrot.slane %v265_v19, 4  ;;  %v239_v23 = vsel %vm201_vm4, %v237_v21, 0.0 }
 0x40a   :  { %v260_v24 = vadd.f32 %v259_v20, %v258_v18  ;;  %240 = vadd.xlane.f32.xlu1 %v239_v23 }
 0x40b   :  { %v267_v25 = vadd.f32 %v266_v22, %v265_v19 }
 0x40c   :  { %v261_v26 = vrot.slane %v260_v24, 2 }
 0x40d   :  { %v268_v27 = vrot.slane %v267_v25, 2  ;;  %v311_v54 = vpop.permute.xlu0 %310 }
 0x40e   :  { %v262_v28 = vadd.f32 %v261_v26, %v260_v24  ;;  %v313_v56 = vsub.f32 %v306_v55, %v311_v54 }
 0x40f   :  { %v269_v29 = vadd.f32 %v268_v27, %v267_v25 }
 0x410   :  { %v263_v30 = vrot.slane %v262_v28, 1  ;;  %v314_v57 = vmul.f32 1.442695, %v313_v56 }
 0x411   :  { %v270_v33 = vrot.slane %v269_v29, 1 }
 0x412   :  { %v264_v34 = vadd.f32 %v263_v30, %v262_v28 }
 0x413   :  { %v271_v35 = vadd.f32 %v270_v33, %v269_v29 }
 0x415   :  { %v274_v37 = vsel %vm198_vm3, %v271_v35, %v264_v34 }
 0x416   :  { %v276_v38 = vadd.f32 %v274_v37, %v251_v36 }
 0x418   :  { %278 = vst.msk [vmem:[#allocation4] sm:$0x3] %vm52_vm5, %v276_v38 }
 0x41f   :  { %v298_v59 = vld [vmem:[#allocation4] sm:$0x3] }
 0x47d   :  { %v241_v41 = vpop.xlane.xlu1 %240 }
 0x47e   :  { %v242_v42 = vadd.f32 %v241_v41, %v226_v40 }
 0x480   :  { %244 = vst.msk [vmem:[#allocation3] sm:$0x3] %vm49_vm2, %v242_v42 }
 0x487   :  { %v283_v43 = vld [vmem:[#allocation3] sm:$0x3] }
 0x488   :  { %410 = vrcp.f32 %v283_v43  ;;  %v295_v47 = vand.u32 2147483648, %v283_v43  ;;  %v293_v49 = vand.u32 2147483647, %v283_v43  ;;  %vm289_vm7 = vweird.f32 %v283_v43 }
 0x489   :  { %412 = vpow2.f32 %v314_v57 }
 0x48a   :  { %v296_v51 = vor.u32 1.1754944e-38, %v295_v47  ;;  %vm294_vm9 = vcmp.eq.f32.partialorder %v293_v49, 8.507059e+37 }
 0x48e   :  { %v411_v44 = vpop.eup %410 }
 0x48f   :  { %v285_v45 = vmul.f32 %v411_v44, %v283_v43  ;;  %vm290_vm6 = vweird.f32 %v411_v44  ;;  %v413_v58 = vpop.eup %412 }
 0x490   :  { %vm291_vm8 = vmor %vm289_vm7, %vm290_vm6 }
 0x491   :  { %v286_v46 = vsub.f32 1.0, %v285_v45 }
 0x493   :  { %v287_v48 = vmul.f32 %v411_v44, %v286_v46 }
 0x495   :  { %v288_v50 = vadd.f32 %v411_v44, %v287_v48 }
 0x497   :  { %v292_v52 = vsel %vm291_vm8, %v411_v44, %v288_v50 }
 0x498   :  { %v297_v53 = vsel %vm294_vm9, %v296_v51, %v292_v52 }
 0x499   :  { %301 = vperm.xlu0 %391, %v297_v53  }
 0x50b   :  { %v302_v60 = vpop.permute.xlu0 %301 }
 0x50c   :  { %v304_v61 = vmul.f32 %v302_v60, %v298_v59  ;;  %v316_v62 = vmul.f32 %v413_v58, %v302_v60 }
 0x50e   :  { %305 = vst.msk [vmem:[#allocation8] sm:$0x3] %vm52_vm5, %v304_v61 }
 0x50f   :  { %317 = vst.msk [vmem:[#allocation9] sm:$0x3] %vm201_vm4, %v316_v62  ;;  %328 = dma.vmem_to_hbm [thread:$0]  %s324_s8, 32, %s326_s27, [#allocation7]  }
 0x510   :  { %339 = dma.vmem_to_hbm [thread:$0]  %s335_s29, 32, %s337_s10, [#allocation10]  }
 0x511   :  { %488 = dma.done.wait [#allocation7], 32  }
 0x512   :  { %489 = vsyncadd [#allocation7], 4294967264 }
 0x513   :  { %490 = dma.done.wait [#allocation10], 32  }
 0x514   :  { %491 = vsyncadd [#allocation10], 4294967264 }
 0x515   :  { %352 = vsyncpa [#allocation6], 1 }
 0x516   :  { %353 = vsyncpa [#allocation7], 1 }
 0x517   :  { %354 = vsyncpa [#allocation10], 1 }

</bundles_post_ra>
